<compile_context>
chip_gen: v6e
topology: v6e:2x2x1
jax: 0.10.0
libtpu: 0.0.40
codegen_flags: <defaults>
</compile_context>

<pallas_src>
import numpy as np
import jax
import jax.numpy as jnp
from jax.experimental import pallas as pl
from jax.experimental.pallas import tpu as pltpu

_HIDDEN = 100
_HIDDEN_PAD = 128   # pad 100 -> 128 for full-lane layouts


def _mlp_kernel(x_ref, w1_ref, b1_ref, w2_ref, b2_ref, w3_ref, b3_ref, out_ref):
    # Cast the streamed f32 rows to bf16 here (fused into the kernel; avoids a
    # separate XLA pass over x in HBM).  No-op if the caller already gave bf16.
    x = x_ref[...].astype(jnp.bfloat16)

    # fc1 (+ folded bn1) + relu     (dropout in eval mode == identity)
    h = jnp.dot(x, w1_ref[...], preferred_element_type=jnp.float32)
    h = jnp.maximum(h + b1_ref[...], 0.0).astype(jnp.bfloat16)

    # fc2 (+ folded bn2) + relu
    h = jnp.dot(h, w2_ref[...], preferred_element_type=jnp.float32)
    h = jnp.maximum(h + b2_ref[...], 0.0).astype(jnp.bfloat16)

    # fc3 (f32 epilogue)
    out_ref[...] = (jnp.dot(h, w3_ref[...], preferred_element_type=jnp.float32)
                    + b3_ref[...])


def _round_up(x, m):
    return (x + m - 1) // m * m


def _tpu_generation():
    """Best-effort TPU generation detection (0 = unknown -> conservative)."""
    try:
        kind = jax.devices()[0].device_kind.lower()
    except Exception:
        return 0
    for tag, gen in (("v7", 7), ("7x", 7), ("v6", 6), ("v5", 5), ("v4", 4)):
        if tag in kind:
            return gen
    return 0


def _tile_and_vmem(n, feat_d_pad, x_itemsize, weight_bytes, gen):
    """Pick the row tile and scoped-VMEM limit per TPU generation.

    VMEM accounting: 2 buffers of the streamed x tile (caller dtype), 2 buffers
    of the lane-padded f32 output block (~tile_n*512 B each), resident weights,
    plus headroom."""
    if gen >= 7:
        x_buf_budget = 12 << 20     # ~3.8 us of DMA at ~3.2 TB/s
    elif gen == 6:
        x_buf_budget = 10 << 20     # ~7 us of DMA at ~1.4 TB/s
    else:
        x_buf_budget = 4 << 20      # v5e / unknown: fits the 16 MiB scoped default

    rows = max(8, x_buf_budget // max(1, feat_d_pad * x_itemsize))
    tile = min(8192, rows, _round_up(n, 8))
    if gen >= 7:
        # Megacore: keep >= 2 roughly balanced grid steps so both TCs get work.
        tile = min(tile, _round_up(pl.cdiv(n, 2), 8))
    tile = max(8, _round_up(tile, 8))

    vmem_need = (2 * tile * feat_d_pad * x_itemsize   # streamed x double buffer
                 + 2 * tile * 128 * 4                 # lane-padded out buffers
                 + 2 * weight_bytes                   # resident operands (<=2 bufs)
                 + (4 << 20))                         # headroom / compiler scratch
    if gen >= 7:
        vmem_limit = min(max(vmem_need, 32 << 20), 48 << 20)   # 64 MiB physical
    elif gen == 6:
        vmem_limit = min(max(vmem_need, 32 << 20), 64 << 20)   # 128 MiB physical
    else:
        vmem_limit = None   # stay on the conservative scoped default
    return tile, vmem_limit


def netd_ins_bi_conv_forward(x, prepared_params, *, tile_n=None):
    """Row-tiled, weight-resident Pallas forward.  `prepared_params` comes from
    prepare_params() (BN folded, hidden 100->128, feat_d padded to x128,
    bf16 matmul operands, f32 biases)."""
    w1, b1, w2, b2, w3, b3 = prepared_params
    params = (w1, b1, w2, b2, w3, b3)
    n = x.shape[0]
    feat_d_pad = w1.shape[0]
    num_classes = w3.shape[1]

    # Lane-dense feature dim: only pads when feat_d is not a multiple of 128
    # (small/odd feat_d); typical 1024/2048/4096 feature dims pass through
    # untouched, so the common case keeps a single HBM read of x.
    if x.shape[1] != feat_d_pad:
        x = jnp.pad(x, ((0, 0), (0, feat_d_pad - x.shape[1])))

    x_itemsize = x.dtype.itemsize
    weight_bytes = int(sum(p.size * p.dtype.itemsize for p in params))
    gen = _tpu_generation()
    auto_tile, vmem_limit = _tile_and_vmem(n, feat_d_pad, x_itemsize,
                                           weight_bytes, gen)
    if tile_n is None:
        tile_n = auto_tile

    grid = (pl.cdiv(n, tile_n),)

    cost = pl.CostEstimate(
        flops=2 * n * (feat_d_pad * _HIDDEN_PAD
                       + _HIDDEN_PAD * _HIDDEN_PAD
                       + _HIDDEN_PAD * num_classes),
        transcendentals=0,
        bytes_accessed=n * feat_d_pad * x_itemsize
                       + n * num_classes * 4
                       + weight_bytes)

    def resident(shape, single_buffer):
        # Constant index_map -> stays in VMEM across all grid steps (no re-DMA).
        idx = lambda i: (0,) * len(shape)
        if single_buffer:
            # Drop the second (never used) VMEM buffer for the resident operands.
            return pl.BlockSpec(shape, idx, pipeline_mode=pl.Buffered(1))
        return pl.BlockSpec(shape, idx)

    def run(single_buffer_weights):
        return pl.pallas_call(
            _mlp_kernel,
            out_shape=jax.ShapeDtypeStruct((n, num_classes), jnp.float32),
            grid=grid,
            in_specs=[
                pl.BlockSpec((tile_n, feat_d_pad), lambda i: (i, 0)),  # streamed x
                resident(w1.shape, single_buffer_weights),
                resident(b1.shape, single_buffer_weights),
                resident(w2.shape, single_buffer_weights),
                resident(b2.shape, single_buffer_weights),
                resident(w3.shape, single_buffer_weights),
                resident(b3.shape, single_buffer_weights),
            ],
            out_specs=pl.BlockSpec((tile_n, num_classes), lambda i: (i, 0)),
            compiler_params=pltpu.CompilerParams(
                dimension_semantics=("parallel",),
                vmem_limit_bytes=vmem_limit),
            cost_estimate=cost,
        )(x, *params)

    try:
        return run(True)
    except Exception:
        # Fallback if this jax build rejects pipeline_mode / Buffered(1): the
        # default double-buffered resident specs are functionally identical.
        return run(False)


def make_params(key, feat_d, num_classes=2, hidden=_HIDDEN):
    """Deterministic synthetic module parameters (distinct keys per tensor).
    Weights are stored (in_features, out_features) so y = x @ W + b."""
    ks = jax.random.split(key, 14)

    def linear(kw, kb, fan_in, fan_out):
        bound = 1.0 / np.sqrt(fan_in)
        w = jax.random.uniform(kw, (fan_in, fan_out), jnp.float32, -bound, bound)
        b = jax.random.uniform(kb, (1, fan_out), jnp.float32, -bound, bound)
        return w, b

    def bn(kg, kb, km, kv, feat):
        gamma = 1.0 + 0.1 * jax.random.normal(kg, (1, feat), jnp.float32)
        beta = 0.1 * jax.random.normal(kb, (1, feat), jnp.float32)
        mean = 0.1 * jax.random.normal(km, (1, feat), jnp.float32)
        var = jnp.abs(1.0 + 0.1 * jax.random.normal(kv, (1, feat), jnp.float32))
        return gamma, beta, mean, var

    w1, b1 = linear(ks[0], ks[1], feat_d, hidden)
    g1, be1, m1, v1 = bn(ks[2], ks[3], ks[4], ks[5], hidden)
    w2, b2 = linear(ks[6], ks[7], hidden, hidden)
    g2, be2, m2, v2 = bn(ks[8], ks[9], ks[10], ks[11], hidden)
    w3, b3 = linear(ks[12], ks[13], hidden, num_classes)
    return (w1, b1, g1, be1, m1, v1, w2, b2, g2, be2, m2, v2, w3, b3)


def prepare_params(raw_params, eps=1e-5):
    """Fold eval-mode BN into the Linears, zero-pad hidden 100->128 and feat_d
    to the next multiple of 128, and cast matmul operands to bf16 (biases stay
    f32 for the f32 epilogue).  All padding is exact (zeros through relu)."""
    (w1, b1, g1, be1, m1, v1,
     w2, b2, g2, be2, m2, v2,
     w3, b3) = raw_params

    s1 = g1 / jnp.sqrt(v1 + eps)
    sh1 = be1 - m1 * s1
    s2 = g2 / jnp.sqrt(v2 + eps)
    sh2 = be2 - m2 * s2

    w1f = w1 * s1                      # column scale
    b1f = b1 * s1 + sh1
    w2f = w2 * s2
    b2f = b2 * s2 + sh2

    h, hp = _HIDDEN, _HIDDEN_PAD
    feat_d = w1.shape[0]
    feat_d_pad = _round_up(feat_d, 128)
    num_classes = w3.shape[1]

    w1p = jnp.zeros((feat_d_pad, hp), jnp.float32).at[:feat_d, :h].set(w1f)
    b1p = jnp.zeros((1, hp), jnp.float32).at[:, :h].set(b1f)
    w2p = jnp.zeros((hp, hp), jnp.float32).at[:h, :h].set(w2f)
    b2p = jnp.zeros((1, hp), jnp.float32).at[:, :h].set(b2f)
    w3p = jnp.zeros((hp, num_classes), jnp.float32).at[:h, :].set(w3)

    return (w1p.astype(jnp.bfloat16), b1p,
            w2p.astype(jnp.bfloat16), b2p,
            w3p.astype(jnp.bfloat16), b3)


def reference_forward_bf16(x, prepared_params):
    """Pure-JAX mirror of the exact kernel compute path (bf16 operands,
    f32 accumulation) — tight-tolerance correctness reference."""
    w1, b1, w2, b2, w3, b3 = prepared_params
    feat_d_pad = w1.shape[0]
    if x.shape[1] != feat_d_pad:
        x = jnp.pad(x, ((0, 0), (0, feat_d_pad - x.shape[1])))
    h = jnp.dot(x.astype(jnp.bfloat16), w1,
                preferred_element_type=jnp.float32) + b1
    h = jnp.maximum(h, 0.0).astype(jnp.bfloat16)
    h = jnp.dot(h, w2, preferred_element_type=jnp.float32) + b2
    h = jnp.maximum(h, 0.0).astype(jnp.bfloat16)
    return jnp.dot(h, w3, preferred_element_type=jnp.float32) + b3


def reference_forward_f32(x, raw_params, eps=1e-5):
    """Full-precision eval-mode module semantics (fc -> bn -> relu) x2 -> fc."""
    (w1, b1, g1, be1, m1, v1,
     w2, b2, g2, be2, m2, v2,
     w3, b3) = raw_params
    s1 = g1 / jnp.sqrt(v1 + eps)
    sh1 = be1 - m1 * s1
    s2 = g2 / jnp.sqrt(v2 + eps)
    sh2 = be2 - m2 * s2
    h = jnp.maximum((x @ w1 + b1) * s1 + sh1, 0.0)
    h = jnp.maximum((h @ w2 + b2) * s2 + sh2, 0.0)
    return h @ w3 + b3


if __name__ == "__main__":
    # TODO(synk): training-mode dropout / batch-statistics BN not implemented
    # (forward is eval-mode, matching F.dropout(training=False) + running stats).
    key = jax.random.PRNGKey(0)
    kx, kp, kx2 = jax.random.split(key, 3)

    # Small deterministic example (batch of ROI feature vectors).
    N, FEAT_D, NUM_CLASSES = 8, 32, 2
    x = jax.random.normal(kx, (N, FEAT_D), jnp.float32)
    raw = make_params(kp, FEAT_D, NUM_CLASSES)
    prepared = prepare_params(raw)

    out = jax.block_until_ready(netd_ins_bi_conv_forward(x, prepared))
    assert out.shape == (N, NUM_CLASSES)

    # Tight check against the exact (bf16-operand, f32-accumulate) compute path.
    np.testing.assert_allclose(np.asarray(out),
                               np.asarray(reference_forward_bf16(x, prepared)),
                               rtol=2e-3, atol=2e-3)
    # Loose check against the full-f32 PyTorch-semantics reference
    # (difference is only the bf16 quantization of x / weights).
    np.testing.assert_allclose(np.asarray(out),
                               np.asarray(reference_forward_f32(x, raw)),
                               rtol=5e-2, atol=5e-2)

    # Ragged / multi-step grid coverage: n not a multiple of tile_n (3 steps,
    # last tile half-full) — exercises clipped writeback of the final block.
    N2 = 20
    x2 = jax.random.normal(kx2, (N2, FEAT_D), jnp.float32)
    out2 = jax.block_until_ready(
        netd_ins_bi_conv_forward(x2, prepared, tile_n=8))
    assert out2.shape == (N2, NUM_CLASSES)
    np.testing.assert_allclose(np.asarray(out2),
                               np.asarray(reference_forward_bf16(x2, prepared)),
                               rtol=2e-3, atol=2e-3)
    np.testing.assert_allclose(np.asarray(out2),
                               np.asarray(reference_forward_f32(x2, raw)),
                               rtol=5e-2, atol=5e-2)

    print("KERNEL_OK")
</pallas_src>

<mosaic_0001>
module attributes {stable_mosaic.version = 11 : i64} {
  func.func @_mlp_kernel(%arg0: i32, %arg1: memref<8x128xf32, #tpu.memory_space<vmem>>, %arg2: memref<128x128xbf16, #tpu.memory_space<vmem>>, %arg3: memref<1x128xf32, #tpu.memory_space<vmem>>, %arg4: memref<128x128xbf16, #tpu.memory_space<vmem>>, %arg5: memref<1x128xf32, #tpu.memory_space<vmem>>, %arg6: memref<128x2xbf16, #tpu.memory_space<vmem>>, %arg7: memref<1x2xf32, #tpu.memory_space<vmem>>, %arg8: memref<8x2xf32, #tpu.memory_space<vmem>>) attributes {dimension_semantics = [#tpu.dimension_semantics<parallel>], iteration_bounds = array<i64: 1>, scalar_prefetch = 0 : i64, scratch_operands = 0 : i64, tpu.core_type = #tpu.core_type<tc>, window_params = [{transform_indices = @transform_0, window_bounds = array<i64: 8, 128>}, {pipeline_mode = #tpu.pipeline_mode<synchronous>, transform_indices = @transform_1, window_bounds = array<i64: 128, 128>}, {pipeline_mode = #tpu.pipeline_mode<synchronous>, transform_indices = @transform_2, window_bounds = array<i64: 1, 128>}, {pipeline_mode = #tpu.pipeline_mode<synchronous>, transform_indices = @transform_3, window_bounds = array<i64: 128, 128>}, {pipeline_mode = #tpu.pipeline_mode<synchronous>, transform_indices = @transform_4, window_bounds = array<i64: 1, 128>}, {pipeline_mode = #tpu.pipeline_mode<synchronous>, transform_indices = @transform_5, window_bounds = array<i64: 128, 2>}, {pipeline_mode = #tpu.pipeline_mode<synchronous>, transform_indices = @transform_6, window_bounds = array<i64: 1, 2>}, {transform_indices = @transform_7, window_bounds = array<i64: 8, 2>}]} {
    %c0 = arith.constant 0 : index
    %c0_0 = arith.constant 0 : index
    %0 = vector.load %arg1[%c0, %c0_0] : memref<8x128xf32, #tpu.memory_space<vmem>>, vector<8x128xf32>
    %1 = arith.truncf %0 : vector<8x128xf32> to vector<8x128xbf16>
    %c0_1 = arith.constant 0 : index
    %c0_2 = arith.constant 0 : index
    %2 = vector.load %arg2[%c0_1, %c0_2] : memref<128x128xbf16, #tpu.memory_space<vmem>>, vector<128x128xbf16>
    %cst = arith.constant dense<0.000000e+00> : vector<8x128xf32>
    %3 = tpu.matmul %1, %2, %cst {dimension_numbers = #tpu.dot_dimension_numbers<[1], [0], [0], [1], [0, 0, 1, 1], [], []>} : vector<8x128xbf16>, vector<128x128xbf16>, vector<8x128xf32> -> vector<8x128xf32>
    %c0_3 = arith.constant 0 : index
    %c0_4 = arith.constant 0 : index
    %4 = vector.load %arg3[%c0_3, %c0_4] : memref<1x128xf32, #tpu.memory_space<vmem>>, vector<1x128xf32>
    %5 = vector.broadcast %4 : vector<1x128xf32> to vector<8x128xf32>
    %6 = arith.addf %3, %5 : vector<8x128xf32>
    %cst_5 = arith.constant 0.000000e+00 : f32
    %7 = vector.broadcast %cst_5 : f32 to vector<8x128xf32>
    %8 = arith.maximumf %6, %7 : vector<8x128xf32>
    %9 = arith.truncf %8 : vector<8x128xf32> to vector<8x128xbf16>
    %c0_6 = arith.constant 0 : index
    %c0_7 = arith.constant 0 : index
    %10 = vector.load %arg4[%c0_6, %c0_7] : memref<128x128xbf16, #tpu.memory_space<vmem>>, vector<128x128xbf16>
    %cst_8 = arith.constant dense<0.000000e+00> : vector<8x128xf32>
    %11 = tpu.matmul %9, %10, %cst_8 {dimension_numbers = #tpu.dot_dimension_numbers<[1], [0], [0], [1], [0, 0, 1, 1], [], []>} : vector<8x128xbf16>, vector<128x128xbf16>, vector<8x128xf32> -> vector<8x128xf32>
    %c0_9 = arith.constant 0 : index
    %c0_10 = arith.constant 0 : index
    %12 = vector.load %arg5[%c0_9, %c0_10] : memref<1x128xf32, #tpu.memory_space<vmem>>, vector<1x128xf32>
    %13 = vector.broadcast %12 : vector<1x128xf32> to vector<8x128xf32>
    %14 = arith.addf %11, %13 : vector<8x128xf32>
    %cst_11 = arith.constant 0.000000e+00 : f32
    %15 = vector.broadcast %cst_11 : f32 to vector<8x128xf32>
    %16 = arith.maximumf %14, %15 : vector<8x128xf32>
    %17 = arith.truncf %16 : vector<8x128xf32> to vector<8x128xbf16>
    %c0_12 = arith.constant 0 : index
    %c0_13 = arith.constant 0 : index
    %18 = vector.load %arg6[%c0_12, %c0_13] : memref<128x2xbf16, #tpu.memory_space<vmem>>, vector<128x2xbf16>
    %cst_14 = arith.constant dense<0.000000e+00> : vector<8x2xf32>
    %19 = tpu.matmul %17, %18, %cst_14 {dimension_numbers = #tpu.dot_dimension_numbers<[1], [0], [0], [1], [0, 0, 1, 1], [], []>} : vector<8x128xbf16>, vector<128x2xbf16>, vector<8x2xf32> -> vector<8x2xf32>
    %c0_15 = arith.constant 0 : index
    %c0_16 = arith.constant 0 : index
    %20 = vector.load %arg7[%c0_15, %c0_16] : memref<1x2xf32, #tpu.memory_space<vmem>>, vector<1x2xf32>
    %21 = vector.broadcast %20 : vector<1x2xf32> to vector<8x2xf32>
    %22 = arith.addf %19, %21 : vector<8x2xf32>
    %c0_17 = arith.constant 0 : index
    %c0_18 = arith.constant 0 : index
    %23 = vector.load %arg8[%c0_17, %c0_18] : memref<8x2xf32, #tpu.memory_space<vmem>>, vector<8x2xf32>
    tpu.vector_store %arg8[%c0_17, %c0_18], %22 {strides = array<i32>} : memref<8x2xf32, #tpu.memory_space<vmem>>, vector<8x2xf32>,
    return
  }
  func.func @transform_0(%arg0: i32) -> (i32, i32) {
    %c0_i32 = arith.constant 0 : i32
    %c0_i32_0 = arith.constant 0 : i32
    return %arg0, %c0_i32 : i32, i32
  }
  func.func @transform_1(%arg0: i32) -> (i32, i32) {
    %c0_i32 = arith.constant 0 : i32
    %c0_i32_0 = arith.constant 0 : i32
    %c0_i32_1 = arith.constant 0 : i32
    return %c0_i32, %c0_i32_0 : i32, i32
  }
  func.func @transform_2(%arg0: i32) -> (i32, i32) {
    %c0_i32 = arith.constant 0 : i32
    %c0_i32_0 = arith.constant 0 : i32
    %c0_i32_1 = arith.constant 0 : i32
    return %c0_i32, %c0_i32_0 : i32, i32
  }
  func.func @transform_3(%arg0: i32) -> (i32, i32) {
    %c0_i32 = arith.constant 0 : i32
    %c0_i32_0 = arith.constant 0 : i32
    %c0_i32_1 = arith.constant 0 : i32
    return %c0_i32, %c0_i32_0 : i32, i32
  }
  func.func @transform_4(%arg0: i32) -> (i32, i32) {
    %c0_i32 = arith.constant 0 : i32
    %c0_i32_0 = arith.constant 0 : i32
    %c0_i32_1 = arith.constant 0 : i32
    return %c0_i32, %c0_i32_0 : i32, i32
  }
  func.func @transform_5(%arg0: i32) -> (i32, i32) {
    %c0_i32 = arith.constant 0 : i32
    %c0_i32_0 = arith.constant 0 : i32
    %c0_i32_1 = arith.constant 0 : i32
    return %c0_i32, %c0_i32_0 : i32, i32
  }
  func.func @transform_6(%arg0: i32) -> (i32, i32) {
    %c0_i32 = arith.constant 0 : i32
    %c0_i32_0 = arith.constant 0 : i32
    %c0_i32_1 = arith.constant 0 : i32
    return %c0_i32, %c0_i32_0 : i32, i32
  }
  func.func @transform_7(%arg0: i32) -> (i32, i32) {
    %c0_i32 = arith.constant 0 : i32
    %c0_i32_0 = arith.constant 0 : i32
    return %arg0, %c0_i32 : i32, i32
  }
}

module attributes {stable_mosaic.version = 11 : i64} {
  func.func @_mlp_kernel(%arg0: i32, %arg1: memref<8x128xf32, #tpu.memory_space<vmem>>, %arg2: memref<128x128xbf16, #tpu.memory_space<vmem>>, %arg3: memref<1x128xf32, #tpu.memory_space<vmem>>, %arg4: memref<128x128xbf16, #tpu.memory_space<vmem>>, %arg5: memref<1x128xf32, #tpu.memory_space<vmem>>, %arg6: memref<128x2xbf16, #tpu.memory_space<vmem>>, %arg7: memref<1x2xf32, #tpu.memory_space<vmem>>, %arg8: memref<8x2xf32, #tpu.memory_space<vmem>>) attributes {dimension_semantics = [#tpu.dimension_semantics<parallel>], iteration_bounds = array<i64: 1>, scalar_prefetch = 0 : i64, scratch_operands = 0 : i64, tpu.core_type = #tpu.core_type<tc>, window_params = [{transform_indices = @transform_0, window_bounds = array<i64: 8, 128>}, {pipeline_mode = #tpu.pipeline_mode<synchronous>, transform_indices = @transform_1, window_bounds = array<i64: 128, 128>}, {pipeline_mode = #tpu.pipeline_mode<synchronous>, transform_indices = @transform_2, window_bounds = array<i64: 1, 128>}, {pipeline_mode = #tpu.pipeline_mode<synchronous>, transform_indices = @transform_3, window_bounds = array<i64: 128, 128>}, {pipeline_mode = #tpu.pipeline_mode<synchronous>, transform_indices = @transform_4, window_bounds = array<i64: 1, 128>}, {pipeline_mode = #tpu.pipeline_mode<synchronous>, transform_indices = @transform_5, window_bounds = array<i64: 128, 2>}, {pipeline_mode = #tpu.pipeline_mode<synchronous>, transform_indices = @transform_6, window_bounds = array<i64: 1, 2>}, {transform_indices = @transform_7, window_bounds = array<i64: 8, 2>}]} {
    %c0 = arith.constant 0 : index
    %c0_0 = arith.constant 0 : index
    %0 = vector.load %arg1[%c0, %c0_0] : memref<8x128xf32, #tpu.memory_space<vmem>>, vector<8x128xf32>
    %1 = arith.truncf %0 : vector<8x128xf32> to vector<8x128xbf16>
    %c0_1 = arith.constant 0 : index
    %c0_2 = arith.constant 0 : index
    %2 = vector.load %arg2[%c0_1, %c0_2] : memref<128x128xbf16, #tpu.memory_space<vmem>>, vector<128x128xbf16>
    %cst = arith.constant dense<0.000000e+00> : vector<8x128xf32>
    %3 = tpu.matmul %1, %2, %cst {dimension_numbers = #tpu.dot_dimension_numbers<[1], [0], [0], [1], [0, 0, 1, 1], [], []>} : vector<8x128xbf16>, vector<128x128xbf16>, vector<8x128xf32> -> vector<8x128xf32>
    %c0_3 = arith.constant 0 : index
    %c0_4 = arith.constant 0 : index
    %4 = vector.load %arg3[%c0_3, %c0_4] : memref<1x128xf32, #tpu.memory_space<vmem>>, vector<1x128xf32>
    %5 = vector.broadcast %4 : vector<1x128xf32> to vector<8x128xf32>
    %6 = arith.addf %3, %5 : vector<8x128xf32>
    %cst_5 = arith.constant 0.000000e+00 : f32
    %7 = vector.broadcast %cst_5 : f32 to vector<8x128xf32>
    %8 = arith.maximumf %6, %7 : vector<8x128xf32>
    %9 = arith.truncf %8 : vector<8x128xf32> to vector<8x128xbf16>
    %c0_6 = arith.constant 0 : index
    %c0_7 = arith.constant 0 : index
    %10 = vector.load %arg4[%c0_6, %c0_7] : memref<128x128xbf16, #tpu.memory_space<vmem>>, vector<128x128xbf16>
    %cst_8 = arith.constant dense<0.000000e+00> : vector<8x128xf32>
    %11 = tpu.matmul %9, %10, %cst_8 {dimension_numbers = #tpu.dot_dimension_numbers<[1], [0], [0], [1], [0, 0, 1, 1], [], []>} : vector<8x128xbf16>, vector<128x128xbf16>, vector<8x128xf32> -> vector<8x128xf32>
    %c0_9 = arith.constant 0 : index
    %c0_10 = arith.constant 0 : index
    %12 = vector.load %arg5[%c0_9, %c0_10] : memref<1x128xf32, #tpu.memory_space<vmem>>, vector<1x128xf32>
    %13 = vector.broadcast %12 : vector<1x128xf32> to vector<8x128xf32>
    %14 = arith.addf %11, %13 : vector<8x128xf32>
    %cst_11 = arith.constant 0.000000e+00 : f32
    %15 = vector.broadcast %cst_11 : f32 to vector<8x128xf32>
    %16 = arith.maximumf %14, %15 : vector<8x128xf32>
    %17 = arith.truncf %16 : vector<8x128xf32> to vector<8x128xbf16>
    %c0_12 = arith.constant 0 : index
    %c0_13 = arith.constant 0 : index
    %18 = vector.load %arg6[%c0_12, %c0_13] : memref<128x2xbf16, #tpu.memory_space<vmem>>, vector<128x2xbf16>
    %cst_14 = arith.constant dense<0.000000e+00> : vector<8x2xf32>
    %19 = tpu.matmul %17, %18, %cst_14 {dimension_numbers = #tpu.dot_dimension_numbers<[1], [0], [0], [1], [0, 0, 1, 1], [], []>} : vector<8x128xbf16>, vector<128x2xbf16>, vector<8x2xf32> -> vector<8x2xf32>
    %c0_15 = arith.constant 0 : index
    %c0_16 = arith.constant 0 : index
    %20 = vector.load %arg7[%c0_15, %c0_16] : memref<1x2xf32, #tpu.memory_space<vmem>>, vector<1x2xf32>
    %21 = vector.broadcast %20 : vector<1x2xf32> to vector<8x2xf32>
    %22 = arith.addf %19, %21 : vector<8x2xf32>
    %c0_17 = arith.constant 0 : index
    %c0_18 = arith.constant 0 : index
    %23 = vector.load %arg8[%c0_17, %c0_18] : memref<8x2xf32, #tpu.memory_space<vmem>>, vector<8x2xf32>
    tpu.vector_store %arg8[%c0_17, %c0_18], %22 {strides = array<i32>} : memref<8x2xf32, #tpu.memory_space<vmem>>, vector<8x2xf32>,
    return
  }
  func.func @transform_0(%arg0: i32) -> (i32, i32) {
    %c0_i32 = arith.constant 0 : i32
    %c0_i32_0 = arith.constant 0 : i32
    return %arg0, %c0_i32 : i32, i32
  }
  func.func @transform_1(%arg0: i32) -> (i32, i32) {
    %c0_i32 = arith.constant 0 : i32
    %c0_i32_0 = arith.constant 0 : i32
    %c0_i32_1 = arith.constant 0 : i32
    return %c0_i32, %c0_i32_0 : i32, i32
  }
  func.func @transform_2(%arg0: i32) -> (i32, i32) {
    %c0_i32 = arith.constant 0 : i32
    %c0_i32_0 = arith.constant 0 : i32
    %c0_i32_1 = arith.constant 0 : i32
    return %c0_i32, %c0_i32_0 : i32, i32
  }
  func.func @transform_3(%arg0: i32) -> (i32, i32) {
    %c0_i32 = arith.constant 0 : i32
    %c0_i32_0 = arith.constant 0 : i32
    %c0_i32_1 = arith.constant 0 : i32
    return %c0_i32, %c0_i32_0 : i32, i32
  }
  func.func @transform_4(%arg0: i32) -> (i32, i32) {
    %c0_i32 = arith.constant 0 : i32
    %c0_i32_0 = arith.constant 0 : i32
    %c0_i32_1 = arith.constant 0 : i32
    return %c0_i32, %c0_i32_0 : i32, i32
  }
  func.func @transform_5(%arg0: i32) -> (i32, i32) {
    %c0_i32 = arith.constant 0 : i32
    %c0_i32_0 = arith.constant 0 : i32
    %c0_i32_1 = arith.constant 0 : i32
    return %c0_i32, %c0_i32_0 : i32, i32
  }
  func.func @transform_6(%arg0: i32) -> (i32, i32) {
    %c0_i32 = arith.constant 0 : i32
    %c0_i32_0 = arith.constant 0 : i32
    %c0_i32_1 = arith.constant 0 : i32
    return %c0_i32, %c0_i32_0 : i32, i32
  }
  func.func @transform_7(%arg0: i32) -> (i32, i32) {
    %c0_i32 = arith.constant 0 : i32
    %c0_i32_0 = arith.constant 0 : i32
    return %arg0, %c0_i32 : i32, i32
  }
}

</mosaic_0001>

<bundles_post_ra>
// kernel: tpu_custom_call.1
= control target key start
LH: loop header
LB: loop body
LE: loop exit
PB: predicated region body
PF: predicated region fallthrough
CT: control target
= control target key end

     0   :  { %12 = vsyncpa [#allocation3], 0  ;;  %s730_s0 = inlined_call_operand.hbm [shape: f32[8,128], index: 0, kind: input, shape index: {}]   ;;  %s731_s1 = inlined_call_operand.vmem [shape: bf16[128,128], index: 1, kind: input, shape index: {}]   ;;  %s732_s2 = inlined_call_operand.vmem [shape: f32[1,128], index: 2, kind: input, shape index: {}]   ;;  %s733_s3 = inlined_call_operand.hbm [shape: bf16[128,128], index: 3, kind: input, shape index: {}]   ;;  %s734_s4 = inlined_call_operand.vmem [shape: f32[1,128], index: 4, kind: input, shape index: {}]   ;;  %s735_s5 = inlined_call_operand.vmem [shape: bf16[128,2], index: 5, kind: input, shape index: {}]   ;;  %s736_s6 = inlined_call_operand.vmem [shape: f32[1,2], index: 6, kind: input, shape index: {}]   ;;  %s737_s7 = inlined_call_operand.vmem [shape: f32[8,2], index: 7, kind: output, shape index: {}]  }
   0x1   :  { %13 = vsyncpa [#allocation5], 0  ;;  %s588_s24 = smov [#allocation2]   ;;  %s589_s26 = smov [#allocation4]  }
   0x2   :  { %s20_s25 = sshll.u32 %s588_s24, 4  ;;  %s33_s27 = sshll.u32 %s589_s26, 4  ;;  %s21_s25 = int_to_ptr.vmem [resolvable:$true] %s20_s25  ;;  %s34_s27 = int_to_ptr.vmem [resolvable:$true] %s33_s27 }
   0x3   :  { %s552_s28 = scalar_lea.vmem %s21_s25, 128  ;;  %p557_p1 = scmp.lt.s32.totalorder %s21_s25, %s21_s25 }
   0x4   :  { %p553_p0 = scmp.ne.s32.totalorder %s21_s25, %s552_s28  ;;  %p558_p2 = scmp.lt.s32.totalorder %s552_s28, %s552_s28 }
   0x6   :  { %p559_p3 = por %p558_p2, %p557_p1 }
   0x8   :  { %p560_p4 = pnand %p559_p3, %p553_p0 }
   0xa   :  { %563 = shalt.err (!%p560_p4)
}
   0xb   :  { %23 = dma.hbm_to_vmem [thread:$0]  %s730_s0, 128, %s21_s25, [#allocation3]  }
   0xc   :  { %s572_s8 = scalar_lea.vmem %s34_s27, 1024  ;;  %p577_p6 = scmp.lt.s32.totalorder %s34_s27, %s34_s27 }
   0xd   :  { %p573_p5 = scmp.ne.s32.totalorder %s34_s27, %s572_s8  ;;  %p578_p7 = scmp.lt.s32.totalorder %s572_s8, %s572_s8 }
   0xf   :  { %p579_p8 = por %p578_p7, %p577_p6 }
  0x11   :  { %p580_p9 = pnand %p579_p8, %p573_p5 }
  0x13   :  { %583 = shalt.err (!%p580_p9)
}
  0x14   :  { %s590_s9 = smov 64   ;;  %s591_s10 = smov 4  }
  0x15   :  { %39 = dma.hbm_to_vmem [thread:$0]  %s733_s3, 1024, %s34_s27, [#allocation5], %s590_s9, %s590_s9, %s591_s10  }
  0x16   :  { %584 = dma.done.wait [#allocation3], 128  }
  0x17   :  { %585 = vsyncadd [#allocation3], 4294967168 }
  0x18   :  { %586 = dma.done.wait [#allocation5], 1024  }
  0x19   :  { %587 = vsyncadd [#allocation5], 4294966272  ;;  %v592_v0 = vmov 0.0   ;;  %vm593_vm0 = vmmov 0   ;;  %v520_v1 = vld [vmem:[%s731_s1 + $0x38] sm:$0xff]   ;;  %v521_v2 = vld [vmem:[%s731_s1 + $0x30] sm:$0xff]  }
  0x1a   :  { %454 = vmatprep.subr.bf16.mxu0 %v592_v0  ;;  %470 = vmatprep.mubr.msk.bf16.mxu0 %vm593_vm0, %v592_v0  ;;  %v522_v3 = vld [vmem:[%s731_s1 + $0x28] sm:$0xff]   ;;  %v528_v4 = vld [vmem:[#allocation4 + $0x38] sm:$0xff]   ;;  %v529_v6 = vld [vmem:[#allocation4 + $0x30] sm:$0xff]   ;;  %vm392_vm1 = vcmask 15360  }
  0x1b   :  { %474 = vmatprep.subr.bf16.mxu1 %v592_v0  ;;  %490 = vmatprep.mubr.msk.bf16.mxu1 %vm593_vm0, %v592_v0  ;;  %v523_v5 = vld [vmem:[%s731_s1 + $0x20] sm:$0xff]   ;;  %v524_v7 = vld [vmem:[%s731_s1 + $0x18] sm:$0xff]   ;;  %v530_v8 = vld [vmem:[#allocation4 + $0x28] sm:$0xff]  }
  0x1c   :  { %455 = vmatpush3.bf16.msra.mxu0 %v520_v1  ;;  %475 = vmatpush3.bf16.msra.mxu1 %v528_v4  ;;  %v525_v9 = vld [vmem:[%s731_s1 + $0x10] sm:$0xff]   ;;  %v531_v10 = vld [vmem:[#allocation4 + $0x20] sm:$0xff]   ;;  %v532_v12 = vld [vmem:[#allocation4 + $0x18] sm:$0xff]  }
  0x1d   :  { %456 = vmatprep.subr.bf16.mxu0 %v592_v0  ;;  %476 = vmatprep.subr.bf16.mxu1 %v592_v0  ;;  %v526_v11 = vld [vmem:[%s731_s1 + $0x8] sm:$0xff]   ;;  %v527_v13 = vld [vmem:[%s731_s1] sm:$0xff]   ;;  %v533_v15 = vld [vmem:[#allocation4 + $0x10] sm:$0xff]  }
  0x1e   :  { %v53_v14 = vld [vmem:[#allocation2] sm:$0xff]  ;;  %v534_v17 = vld [vmem:[#allocation4 + $0x8] sm:$0xff]   ;;  %v535_v18 = vld [vmem:[#allocation4] sm:$0xff]  }
  0x1f   :  { %v54_v16 = vpack.c.bf16 %v53_v14, %v53_v14  ;;  %v536_v19 = vld [vmem:[%s735_s5 + $0x38] sm:$0xff]   ;;  %v537_v20 = vld [vmem:[%s735_s5 + $0x30] sm:$0xff]   ;;  %v538_v21 = vld [vmem:[%s735_s5 + $0x28] sm:$0xff]  }
  0x20   :  { %457 = vmatpush3.bf16.msra.mxu0 %v521_v2  ;;  %477 = vmatpush3.bf16.msra.mxu1 %v529_v6  ;;  %v539_v22 = vld [vmem:[%s735_s5 + $0x20] sm:$0xff]   ;;  %v540_v23 = vld [vmem:[%s735_s5 + $0x18] sm:$0xff]   ;;  %v541_v24 = vld [vmem:[%s735_s5 + $0x10] sm:$0xff]  }
  0x21   :  { %458 = vmatprep.subr.bf16.mxu0 %v592_v0  ;;  %478 = vmatprep.subr.bf16.mxu1 %v592_v0  ;;  %v400_v25 = vld [vmem:[%s732_s2] ss:$0 sm:$0xff]  ;;  %v542_v33 = vld [vmem:[%s735_s5 + $0x8] sm:$0xff]  }
  0x22   :  { %v543_v34 = vld [vmem:[%s735_s5] sm:$0xff]  }
  0x23   :  { %v409_v35 = vld [vmem:[%s734_s4] ss:$0 sm:$0xff] }
  0x24   :  { %459 = vmatpush3.bf16.msra.mxu0 %v522_v3  ;;  %479 = vmatpush3.bf16.msra.mxu1 %v530_v8  ;;  %v418_v43 = vld [vmem:[%s736_s6] ss:$0 sm:$0xff] }
  0x25   :  { %460 = vmatprep.subr.bf16.mxu0 %v592_v0  ;;  %480 = vmatprep.subr.bf16.mxu1 %v592_v0 }
  0x28   :  { %461 = vmatpush3.bf16.msra.mxu0 %v523_v5  ;;  %481 = vmatpush3.bf16.msra.mxu1 %v531_v10 }
  0x29   :  { %462 = vmatprep.subr.bf16.mxu0 %v592_v0  ;;  %482 = vmatprep.subr.bf16.mxu1 %v592_v0 }
  0x2c   :  { %463 = vmatpush3.bf16.msra.mxu0 %v524_v7  ;;  %483 = vmatpush3.bf16.msra.mxu1 %v532_v12 }
  0x2d   :  { %464 = vmatprep.subr.bf16.mxu0 %v592_v0  ;;  %484 = vmatprep.subr.bf16.mxu1 %v592_v0 }
  0x30   :  { %465 = vmatpush3.bf16.msra.mxu0 %v525_v9  ;;  %485 = vmatpush3.bf16.msra.mxu1 %v533_v15 }
  0x31   :  { %466 = vmatprep.subr.bf16.mxu0 %v592_v0  ;;  %486 = vmatprep.subr.bf16.mxu1 %v592_v0 }
  0x34   :  { %467 = vmatpush3.bf16.msra.mxu0 %v526_v11  ;;  %487 = vmatpush3.bf16.msra.mxu1 %v534_v17 }
  0x35   :  { %468 = vmatprep.subr.bf16.mxu0 %v592_v0  ;;  %488 = vmatprep.subr.bf16.mxu1 %v592_v0 }
  0x38   :  { %469 = vmatpush3.bf16.msra.mxu0 %v527_v13  ;;  %489 = vmatpush3.bf16.msra.mxu1 %v535_v18 }
  0x39   :  { %494 = vmatprep.subr.bf16.mxu0 %v592_v0 }
  0x3b   :  { %471 = vmatmul.mubr.bf16.vlgmr.msra.gmra.mxu0 %v54_v16 }
  0x3c   :  { %510 = vmatprep.mubr.msk.bf16.mxu0 %vm593_vm0, %v592_v0  ;;  %495 = vmatpush3.bf16.msra.mxu0 %v536_v19 }
  0x3d   :  { %496 = vmatprep.subr.bf16.mxu0 %v592_v0 }
  0x40   :  { %497 = vmatpush3.bf16.msra.mxu0 %v537_v20 }
  0x41   :  { %498 = vmatprep.subr.bf16.mxu0 %v592_v0 }
  0x44   :  { %499 = vmatpush3.bf16.msra.mxu0 %v538_v21 }
  0x45   :  { %500 = vmatprep.subr.bf16.mxu0 %v592_v0 }
  0x48   :  { %501 = vmatpush3.bf16.msra.mxu0 %v539_v22 }
  0x49   :  { %502 = vmatprep.subr.bf16.mxu0 %v592_v0 }
  0x4c   :  { %503 = vmatpush3.bf16.msra.mxu0 %v540_v23 }
  0x4d   :  { %504 = vmatprep.subr.bf16.mxu0 %v592_v0 }
  0x50   :  { %505 = vmatpush3.bf16.msra.mxu0 %v541_v24 }
  0x51   :  { %506 = vmatprep.subr.bf16.mxu0 %v592_v0 }
  0x54   :  { %507 = vmatpush3.bf16.msra.mxu0 %v542_v33 }
  0x55   :  { %508 = vmatprep.subr.bf16.mxu0 %v592_v0 }
  0x58   :  { %509 = vmatpush3.bf16.msra.mxu0 %v543_v34 }
  0xfb   :  { %v160_v26 = vpop.f32.mrf.mxu0 }
  0xfc   :  { %v161_v27 = vadd.f32 %v400_v25, %v160_v26 }
  0xfd   :  { %v472_v28 = vpop.f32.mrf.mxu0 }
  0xfe   :  { %v166_v29 = vmax.f32 %v161_v27, 0.0 }
  0xff   :  { %v163_v30 = vpop.f32.mrf.mxu0 }
 0x100   :  { %v167_v31 = vpack.c.bf16 %v166_v29, %v166_v29 }
 0x101   :  { %v473_v32 = vpop.f32.mrf.mxu0 }
 0x102   :  { %491 = vmatmul.mubr.bf16.vlgmr.msra.gmra.mxu1 %v167_v31 }
 0x1c2   :  { %v273_v36 = vpop.f32.mrf.mxu1 }
 0x1c3   :  { %v274_v37 = vadd.f32 %v409_v35, %v273_v36 }
 0x1c4   :  { %v492_v38 = vpop.f32.mrf.mxu1 }
 0x1c5   :  { %v279_v39 = vmax.f32 %v274_v37, 0.0 }
 0x1c6   :  { %v276_v40 = vpop.f32.mrf.mxu1 }
 0x1c7   :  { %v280_v41 = vpack.c.bf16 %v279_v39, %v279_v39 }
 0x1c8   :  { %v493_v42 = vpop.f32.mrf.mxu1 }
 0x1c9   :  { %511 = vmatmul.mubr.bf16.vlgmr.msra.gmra.mxu0 %v280_v41 }
 0x289   :  { %v386_v44 = vpop.f32.mrf.mxu0 }
 0x28a   :  { %v387_v45 = vadd.f32 %v418_v43, %v386_v44 }
 0x28b   :  { %v512_v46 = vpop.f32.mrf.mxu0 }
 0x28c   :  { %393 = vst.msk [vmem:[%s737_s7] sm:$0xff] %vm392_vm1, %v387_v45 }
 0x28d   :  { %v389_v47 = vpop.f32.mrf.mxu0 }
 0x28f   :  { %v513_v48 = vpop.f32.mrf.mxu0 }
 0x290   :  { %398 = vsyncpa [#allocation3], 1 }
 0x291   :  { %399 = vsyncpa [#allocation5], 1 }

// kernel: tpu_custom_call.1
= control target key start
LH: loop header
LB: loop body
LE: loop exit
PB: predicated region body
PF: predicated region fallthrough
CT: control target
= control target key end

     0   :  { %12 = vsyncpa [#allocation3], 0  ;;  %s730_s0 = inlined_call_operand.hbm [shape: f32[8,128], index: 0, kind: input, shape index: {}]   ;;  %s731_s1 = inlined_call_operand.vmem [shape: bf16[128,128], index: 1, kind: input, shape index: {}]   ;;  %s732_s2 = inlined_call_operand.vmem [shape: f32[1,128], index: 2, kind: input, shape index: {}]   ;;  %s733_s3 = inlined_call_operand.hbm [shape: bf16[128,128], index: 3, kind: input, shape index: {}]   ;;  %s734_s4 = inlined_call_operand.vmem [shape: f32[1,128], index: 4, kind: input, shape index: {}]   ;;  %s735_s5 = inlined_call_operand.vmem [shape: bf16[128,2], index: 5, kind: input, shape index: {}]   ;;  %s736_s6 = inlined_call_operand.vmem [shape: f32[1,2], index: 6, kind: input, shape index: {}]   ;;  %s737_s7 = inlined_call_operand.vmem [shape: f32[8,2], index: 7, kind: output, shape index: {}]  }
   0x1   :  { %13 = vsyncpa [#allocation5], 0  ;;  %s588_s24 = smov [#allocation2]   ;;  %s589_s26 = smov [#allocation4]  }
   0x2   :  { %s20_s25 = sshll.u32 %s588_s24, 4  ;;  %s33_s27 = sshll.u32 %s589_s26, 4  ;;  %s21_s25 = int_to_ptr.vmem [resolvable:$true] %s20_s25  ;;  %s34_s27 = int_to_ptr.vmem [resolvable:$true] %s33_s27 }
   0x3   :  { %s552_s28 = scalar_lea.vmem %s21_s25, 128  ;;  %p557_p1 = scmp.lt.s32.totalorder %s21_s25, %s21_s25 }
   0x4   :  { %p553_p0 = scmp.ne.s32.totalorder %s21_s25, %s552_s28  ;;  %p558_p2 = scmp.lt.s32.totalorder %s552_s28, %s552_s28 }
   0x6   :  { %p559_p3 = por %p558_p2, %p557_p1 }
   0x8   :  { %p560_p4 = pnand %p559_p3, %p553_p0 }
   0xa   :  { %563 = shalt.err (!%p560_p4)
}
   0xb   :  { %23 = dma.hbm_to_vmem [thread:$0]  %s730_s0, 128, %s21_s25, [#allocation3]  }
   0xc   :  { %s572_s8 = scalar_lea.vmem %s34_s27, 1024  ;;  %p577_p6 = scmp.lt.s32.totalorder %s34_s27, %s34_s27 }
   0xd   :  { %p573_p5 = scmp.ne.s32.totalorder %s34_s27, %s572_s8  ;;  %p578_p7 = scmp.lt.s32.totalorder %s572_s8, %s572_s8 }
   0xf   :  { %p579_p8 = por %p578_p7, %p577_p6 }
  0x11   :  { %p580_p9 = pnand %p579_p8, %p573_p5 }
  0x13   :  { %583 = shalt.err (!%p580_p9)
}
  0x14   :  { %s590_s9 = smov 64   ;;  %s591_s10 = smov 4  }
  0x15   :  { %39 = dma.hbm_to_vmem [thread:$0]  %s733_s3, 1024, %s34_s27, [#allocation5], %s590_s9, %s590_s9, %s591_s10  }
  0x16   :  { %584 = dma.done.wait [#allocation3], 128  }
  0x17   :  { %585 = vsyncadd [#allocation3], 4294967168 }
  0x18   :  { %586 = dma.done.wait [#allocation5], 1024  }
  0x19   :  { %587 = vsyncadd [#allocation5], 4294966272  ;;  %v592_v0 = vmov 0.0   ;;  %vm593_vm0 = vmmov 0   ;;  %v520_v1 = vld [vmem:[%s731_s1 + $0x38] sm:$0xff]   ;;  %v521_v2 = vld [vmem:[%s731_s1 + $0x30] sm:$0xff]  }
  0x1a   :  { %454 = vmatprep.subr.bf16.mxu0 %v592_v0  ;;  %470 = vmatprep.mubr.msk.bf16.mxu0 %vm593_vm0, %v592_v0  ;;  %v522_v3 = vld [vmem:[%s731_s1 + $0x28] sm:$0xff]   ;;  %v528_v4 = vld [vmem:[#allocation4 + $0x38] sm:$0xff]   ;;  %v529_v6 = vld [vmem:[#allocation4 + $0x30] sm:$0xff]   ;;  %vm392_vm1 = vcmask 15360  }
  0x1b   :  { %474 = vmatprep.subr.bf16.mxu1 %v592_v0  ;;  %490 = vmatprep.mubr.msk.bf16.mxu1 %vm593_vm0, %v592_v0  ;;  %v523_v5 = vld [vmem:[%s731_s1 + $0x20] sm:$0xff]   ;;  %v524_v7 = vld [vmem:[%s731_s1 + $0x18] sm:$0xff]   ;;  %v530_v8 = vld [vmem:[#allocation4 + $0x28] sm:$0xff]  }
  0x1c   :  { %455 = vmatpush3.bf16.msra.mxu0 %v520_v1  ;;  %475 = vmatpush3.bf16.msra.mxu1 %v528_v4  ;;  %v525_v9 = vld [vmem:[%s731_s1 + $0x10] sm:$0xff]   ;;  %v531_v10 = vld [vmem:[#allocation4 + $0x20] sm:$0xff]   ;;  %v532_v12 = vld [vmem:[#allocation4 + $0x18] sm:$0xff]  }
  0x1d   :  { %456 = vmatprep.subr.bf16.mxu0 %v592_v0  ;;  %476 = vmatprep.subr.bf16.mxu1 %v592_v0  ;;  %v526_v11 = vld [vmem:[%s731_s1 + $0x8] sm:$0xff]   ;;  %v527_v13 = vld [vmem:[%s731_s1] sm:$0xff]   ;;  %v533_v15 = vld [vmem:[#allocation4 + $0x10] sm:$0xff]  }
  0x1e   :  { %v53_v14 = vld [vmem:[#allocation2] sm:$0xff]  ;;  %v534_v17 = vld [vmem:[#allocation4 + $0x8] sm:$0xff]   ;;  %v535_v18 = vld [vmem:[#allocation4] sm:$0xff]  }
  0x1f   :  { %v54_v16 = vpack.c.bf16 %v53_v14, %v53_v14  ;;  %v536_v19 = vld [vmem:[%s735_s5 + $0x38] sm:$0xff]   ;;  %v537_v20 = vld [vmem:[%s735_s5 + $0x30] sm:$0xff]   ;;  %v538_v21 = vld [vmem:[%s735_s5 + $0x28] sm:$0xff]  }
  0x20   :  { %457 = vmatpush3.bf16.msra.mxu0 %v521_v2  ;;  %477 = vmatpush3.bf16.msra.mxu1 %v529_v6  ;;  %v539_v22 = vld [vmem:[%s735_s5 + $0x20] sm:$0xff]   ;;  %v540_v23 = vld [vmem:[%s735_s5 + $0x18] sm:$0xff]   ;;  %v541_v24 = vld [vmem:[%s735_s5 + $0x10] sm:$0xff]  }
  0x21   :  { %458 = vmatprep.subr.bf16.mxu0 %v592_v0  ;;  %478 = vmatprep.subr.bf16.mxu1 %v592_v0  ;;  %v400_v25 = vld [vmem:[%s732_s2] ss:$0 sm:$0xff]  ;;  %v542_v33 = vld [vmem:[%s735_s5 + $0x8] sm:$0xff]  }
  0x22   :  { %v543_v34 = vld [vmem:[%s735_s5] sm:$0xff]  }
  0x23   :  { %v409_v35 = vld [vmem:[%s734_s4] ss:$0 sm:$0xff] }
  0x24   :  { %459 = vmatpush3.bf16.msra.mxu0 %v522_v3  ;;  %479 = vmatpush3.bf16.msra.mxu1 %v530_v8  ;;  %v418_v43 = vld [vmem:[%s736_s6] ss:$0 sm:$0xff] }
  0x25   :  { %460 = vmatprep.subr.bf16.mxu0 %v592_v0  ;;  %480 = vmatprep.subr.bf16.mxu1 %v592_v0 }
  0x28   :  { %461 = vmatpush3.bf16.msra.mxu0 %v523_v5  ;;  %481 = vmatpush3.bf16.msra.mxu1 %v531_v10 }
  0x29   :  { %462 = vmatprep.subr.bf16.mxu0 %v592_v0  ;;  %482 = vmatprep.subr.bf16.mxu1 %v592_v0 }
  0x2c   :  { %463 = vmatpush3.bf16.msra.mxu0 %v524_v7  ;;  %483 = vmatpush3.bf16.msra.mxu1 %v532_v12 }
  0x2d   :  { %464 = vmatprep.subr.bf16.mxu0 %v592_v0  ;;  %484 = vmatprep.subr.bf16.mxu1 %v592_v0 }
  0x30   :  { %465 = vmatpush3.bf16.msra.mxu0 %v525_v9  ;;  %485 = vmatpush3.bf16.msra.mxu1 %v533_v15 }
  0x31   :  { %466 = vmatprep.subr.bf16.mxu0 %v592_v0  ;;  %486 = vmatprep.subr.bf16.mxu1 %v592_v0 }
  0x34   :  { %467 = vmatpush3.bf16.msra.mxu0 %v526_v11  ;;  %487 = vmatpush3.bf16.msra.mxu1 %v534_v17 }
  0x35   :  { %468 = vmatprep.subr.bf16.mxu0 %v592_v0  ;;  %488 = vmatprep.subr.bf16.mxu1 %v592_v0 }
  0x38   :  { %469 = vmatpush3.bf16.msra.mxu0 %v527_v13  ;;  %489 = vmatpush3.bf16.msra.mxu1 %v535_v18 }
  0x39   :  { %494 = vmatprep.subr.bf16.mxu0 %v592_v0 }
  0x3b   :  { %471 = vmatmul.mubr.bf16.vlgmr.msra.gmra.mxu0 %v54_v16 }
  0x3c   :  { %510 = vmatprep.mubr.msk.bf16.mxu0 %vm593_vm0, %v592_v0  ;;  %495 = vmatpush3.bf16.msra.mxu0 %v536_v19 }
  0x3d   :  { %496 = vmatprep.subr.bf16.mxu0 %v592_v0 }
  0x40   :  { %497 = vmatpush3.bf16.msra.mxu0 %v537_v20 }
  0x41   :  { %498 = vmatprep.subr.bf16.mxu0 %v592_v0 }
  0x44   :  { %499 = vmatpush3.bf16.msra.mxu0 %v538_v21 }
  0x45   :  { %500 = vmatprep.subr.bf16.mxu0 %v592_v0 }
  0x48   :  { %501 = vmatpush3.bf16.msra.mxu0 %v539_v22 }
  0x49   :  { %502 = vmatprep.subr.bf16.mxu0 %v592_v0 }
  0x4c   :  { %503 = vmatpush3.bf16.msra.mxu0 %v540_v23 }
  0x4d   :  { %504 = vmatprep.subr.bf16.mxu0 %v592_v0 }
  0x50   :  { %505 = vmatpush3.bf16.msra.mxu0 %v541_v24 }
  0x51   :  { %506 = vmatprep.subr.bf16.mxu0 %v592_v0 }
  0x54   :  { %507 = vmatpush3.bf16.msra.mxu0 %v542_v33 }
  0x55   :  { %508 = vmatprep.subr.bf16.mxu0 %v592_v0 }
  0x58   :  { %509 = vmatpush3.bf16.msra.mxu0 %v543_v34 }
  0xfb   :  { %v160_v26 = vpop.f32.mrf.mxu0 }
  0xfc   :  { %v161_v27 = vadd.f32 %v400_v25, %v160_v26 }
  0xfd   :  { %v472_v28 = vpop.f32.mrf.mxu0 }
  0xfe   :  { %v166_v29 = vmax.f32 %v161_v27, 0.0 }
  0xff   :  { %v163_v30 = vpop.f32.mrf.mxu0 }
 0x100   :  { %v167_v31 = vpack.c.bf16 %v166_v29, %v166_v29 }
 0x101   :  { %v473_v32 = vpop.f32.mrf.mxu0 }
 0x102   :  { %491 = vmatmul.mubr.bf16.vlgmr.msra.gmra.mxu1 %v167_v31 }
 0x1c2   :  { %v273_v36 = vpop.f32.mrf.mxu1 }
 0x1c3   :  { %v274_v37 = vadd.f32 %v409_v35, %v273_v36 }
 0x1c4   :  { %v492_v38 = vpop.f32.mrf.mxu1 }
 0x1c5   :  { %v279_v39 = vmax.f32 %v274_v37, 0.0 }
 0x1c6   :  { %v276_v40 = vpop.f32.mrf.mxu1 }
 0x1c7   :  { %v280_v41 = vpack.c.bf16 %v279_v39, %v279_v39 }
 0x1c8   :  { %v493_v42 = vpop.f32.mrf.mxu1 }
 0x1c9   :  { %511 = vmatmul.mubr.bf16.vlgmr.msra.gmra.mxu0 %v280_v41 }
 0x289   :  { %v386_v44 = vpop.f32.mrf.mxu0 }
 0x28a   :  { %v387_v45 = vadd.f32 %v418_v43, %v386_v44 }
 0x28b   :  { %v512_v46 = vpop.f32.mrf.mxu0 }
 0x28c   :  { %393 = vst.msk [vmem:[%s737_s7] sm:$0xff] %vm392_vm1, %v387_v45 }
 0x28d   :  { %v389_v47 = vpop.f32.mrf.mxu0 }
 0x28f   :  { %v513_v48 = vpop.f32.mrf.mxu0 }
 0x290   :  { %398 = vsyncpa [#allocation3], 1 }
 0x291   :  { %399 = vsyncpa [#allocation5], 1 }

</bundles_post_ra>
